<compile_context>
chip_gen: v7x
topology: tpu7x:2x2x1
jax: 0.10.0
libtpu: 0.0.40
codegen_flags: <defaults>
</compile_context>

<pallas_src>
import functools

import jax
import jax.numpy as jnp
import numpy as np
from jax import lax
from jax.experimental import pallas as pl
from jax.experimental.pallas import tpu as pltpu

LANE = 128  # TPU lane width; embedding dim is zero-padded to a multiple of this.


def _round_up(x, m):
    return ((x + m - 1) // m) * m


def _vmem_limit_bytes():
    # v7x: 64 MiB physical VMEM per TensorCore -> budget ~48 MiB.
    # v5e/v6e: 128 MiB physical -> budget ~96 MiB.
    cap = 64 * 1024 * 1024
    try:
        cap = int(getattr(pltpu.get_tpu_info(), "vmem_capacity_bytes", cap))
    except Exception:
        pass
    return int(min(cap * 3 // 4, 100 * 1024 * 1024))


# ---------------------------------------------------------------------------
# Kernel 1: stand-in SBERT sentence encoder (per-token linear + masked mean
# pooling), batch-tiled grid, megacore-parallel.
# ---------------------------------------------------------------------------
def _encoder_kernel(tok_ref, mask_ref, w_ref, emb_ref):
    tok = tok_ref[...]                                   # [tN, L, D] f32
    mask = mask_ref[...]                                 # [tN, L, 1] f32 (L on sublanes, like tok)
    # Mask folded BEFORE the matmul (the stand-in encoder is linear):
    # masked token sum -> [tN, D], then ONE [tN, D] @ [D, Hp] MXU matmul.
    masked_sum = jnp.sum(tok * mask, axis=1)             # [tN, D]
    denom = jnp.maximum(jnp.sum(mask, axis=1), 1e-9)     # [tN, 1]
    # EUP reciprocal applied on the narrow [tN, D] operand (before the matmul).
    pooled = masked_sum * pl.reciprocal(denom, approx=True)
    # Matmul kept f32: encoder rounding error is absolute (not covered by rtol
    # on the centroids); bf16 here is an option on v6e/v7x if parity allows.
    emb_ref[...] = jnp.dot(pooled, w_ref[...], preferred_element_type=jnp.float32)


def _pick_tile_n(n, l, d, hp, vmem_limit):
    # Conservative per-row VMEM accounting (minor dims pad to 128 lanes):
    # tok tile + mask tile + output tile, f32.
    bytes_per_row = 4 * (l * _round_up(d, LANE) + l * LANE + hp)
    t = (vmem_limit // 4) // max(bytes_per_row, 1)       # /4: double buffers + slack
    t = int(max(min(t, 512), 8))
    t = (t // 8) * 8                                     # sublane-aligned tile
    return max(min(t, _round_up(n, 8)), 8)


def _encode(tok, mask, w_pad, tile_n, vmem_limit):
    n, l, d = tok.shape
    hp = w_pad.shape[1]
    if tile_n is None:
        tile_n = _pick_tile_n(n, l, d, hp, vmem_limit)
    # Pad N up to a multiple of tile_n (zero mask rows -> zero embeddings);
    # keeps the tiled, double-buffered pipeline for every N.
    n_pad = _round_up(n, tile_n)
    if n_pad != n:
        tok = jnp.pad(tok, ((0, n_pad - n), (0, 0), (0, 0)))
        mask = jnp.pad(mask, ((0, n_pad - n), (0, 0)))
    mask3 = mask[:, :, None]                             # [n_pad, L, 1]
    grid = (n_pad // tile_n,)
    cost = pl.CostEstimate(
        flops=2 * n_pad * l * d + 2 * n_pad * d * hp,
        transcendentals=n_pad,
        bytes_accessed=4 * (n_pad * l * d + n_pad * l + d * hp + n_pad * hp))
    emb = pl.pallas_call(
        _encoder_kernel,
        out_shape=jax.ShapeDtypeStruct((n_pad, hp), jnp.float32),
        grid=grid,
        in_specs=[
            pl.BlockSpec((tile_n, l, d), lambda i: (i, 0, 0)),   # token tile
            pl.BlockSpec((tile_n, l, 1), lambda i: (i, 0, 0)),   # mask tile (L on sublanes)
            pl.BlockSpec((d, hp), lambda i: (0, 0)),             # resident weight
        ],
        out_specs=pl.BlockSpec((tile_n, hp), lambda i: (i, 0)),  # lane-dense output
        compiler_params=pltpu.CompilerParams(
            dimension_semantics=("parallel",),                   # megacore sharding
            vmem_limit_bytes=vmem_limit),
        cost_estimate=cost,
    )(tok, mask3, w_pad)
    return emb[:n]


# ---------------------------------------------------------------------------
# Kernel 2: DKM (soft k-means) iterations, assignment kept lane-dense [K, N].
# ---------------------------------------------------------------------------
def _dkm_kernel(x_ref, xx_ref, c0_ref, c_out_ref, a_out_ref, *, num_iters, alpha):
    x = x_ref[...]                                  # [N, Hp] f32
    x_bf = x.astype(jnp.bfloat16)                   # hoisted, loop-invariant MXU operand
    xx = xx_ref[...]                                # [1, N]  |x_n|^2 (loop-invariant)
    n = x.shape[0]
    k = c0_ref.shape[0]

    def body(_, carry):
        c, _a_prev = carry                          # c: [K, Hp] f32
        c_bf = c.astype(jnp.bfloat16)
        # Gram-form squared distance on the MXU ("NT" matmul, like q @ k^T):
        #   dist2[k, n] = |c_k|^2 - 2 <c_k, x_n> + |x_n|^2
        xc = lax.dot_general(c_bf, x_bf, (((1,), (1,)), ((), ())),
                             preferred_element_type=jnp.float32)          # [K, N]
        cc = jnp.sum(c * c, axis=1, keepdims=True)                        # [K, 1]
        dist = jnp.sqrt(jnp.maximum(cc - 2.0 * xc + xx, 0.0))             # [K, N]
        # Soft assignment: softmax over clusters. K sits on the sublane axis so
        # N (the lane axis) stays fully dense for every VPU op here.
        logits = -alpha * dist
        logits = logits - jnp.max(logits, axis=0, keepdims=True)
        e = jnp.exp(logits)
        a = e / jnp.sum(e, axis=0, keepdims=True)                         # [K, N] exact div
        # Centroid update C = (a @ x) / counts: normalize the small [K, N]
        # matrix first, then a single lane-dense MXU matmul.
        counts = jnp.maximum(jnp.sum(a, axis=1, keepdims=True), 1e-9)     # [K, 1]
        a_norm = (a * pl.reciprocal(counts, approx=True)).astype(jnp.bfloat16)
        c_new = lax.dot_general(a_norm, x_bf, (((1,), (0,)), ((), ())),
                                preferred_element_type=jnp.float32)       # [K, Hp]
        return c_new, a

    c_fin, a_fin = lax.fori_loop(
        0, num_iters, body,
        (c0_ref[...], jnp.zeros((k, n), jnp.float32)),
        unroll=2)  # partial unroll: LLO visibility without 10x live ranges / spills
    c_out_ref[...] = c_fin                          # [K, Hp] lane-dense
    a_out_ref[...] = a_fin                          # [K, N]  lane-dense store


def _dkm(emb, init_c, num_iters, alpha, vmem_limit):
    n, hp = emb.shape
    k = init_c.shape[0]
    # |x_n|^2 is loop-invariant; compute once (lane-major [1, N]) outside the loop.
    xx = jnp.sum(emb * emb, axis=1)[None, :]
    vmem = pl.BlockSpec(memory_space=pltpu.MemorySpace.VMEM)
    cost = pl.CostEstimate(
        flops=num_iters * (4 * n * k * hp + 8 * n * k),
        transcendentals=num_iters * 2 * n * k,
        bytes_accessed=4 * (n * hp + n + k * hp + k * hp + k * n))
    return pl.pallas_call(
        functools.partial(_dkm_kernel, num_iters=num_iters, alpha=alpha),
        out_shape=(jax.ShapeDtypeStruct((k, hp), jnp.float32),
                   jax.ShapeDtypeStruct((k, n), jnp.float32)),
        in_specs=[vmem, vmem, vmem],
        out_specs=(vmem, vmem),
        compiler_params=pltpu.CompilerParams(vmem_limit_bytes=vmem_limit),
        cost_estimate=cost,
    )(emb, xx, init_c)


# ---------------------------------------------------------------------------
# Forward wrapper (== QSClustering_Model.forward)
# ---------------------------------------------------------------------------
def qs_clustering_forward(tok, mask, w_emb, init_idx, *,
                          num_iters=10, alpha=2.0, tile_n=None):
    assert num_iters >= 1, "DKM needs at least one iteration to produce `a`"
    n, l, d = tok.shape
    h = w_emb.shape[1]
    hp = max(LANE, _round_up(h, LANE))
    vmem_limit = _vmem_limit_bytes()
    # Lane-dense zero-padding of the embedding dim; padded dims are zero for
    # both points and centroids so distances / assignments are unchanged.
    w_pad = jnp.zeros((d, hp), jnp.float32).at[:, :h].set(w_emb.astype(jnp.float32))

    emb = _encode(tok.astype(jnp.float32), mask.astype(jnp.float32),
                  w_pad, tile_n, vmem_limit)

    # TODO(synk): python random.sample(range(N), k) is replaced by caller-
    # supplied deterministic (seeded) indices to keep the script reproducible.
    init_c = jnp.take(emb, init_idx, axis=0)                 # [K, Hp]

    c_pad, a_kn = _dkm(emb, init_c, num_iters, alpha, vmem_limit)
    # Kernel keeps the assignment lane-dense as [K, N]; one tiny transpose here.
    return c_pad[:, :h], a_kn.T                              # (C [K, H], a [N, K])


# ---------------------------------------------------------------------------
# Pure-JAX reference (same stand-ins, exact f32 math)
# ---------------------------------------------------------------------------
def _reference(tok, mask, w_emb, init_idx, num_iters, alpha):
    htok = jnp.einsum('nld,dh->nlh', tok, w_emb)               # token encoder
    s = jnp.sum(htok * mask[:, :, None], axis=1)
    emb = s / jnp.maximum(jnp.sum(mask, axis=1, keepdims=True), 1e-9)  # pooling
    c = emb[init_idx]                                          # init centroids
    a = jnp.zeros((emb.shape[0], c.shape[0]), jnp.float32)
    for _ in range(num_iters):                                 # DKM iterations
        diff = emb[:, None, :] - c[None, :, :]
        dist = jnp.sqrt(jnp.maximum(jnp.sum(diff * diff, axis=-1), 0.0))
        a = jax.nn.softmax(-alpha * dist, axis=1)
        c = (a.T @ emb) / jnp.maximum(jnp.sum(a, axis=0)[:, None], 1e-9)
    return c, a


if __name__ == "__main__":
    N, L, D, H, K = 16, 8, 32, 32, 2
    NUM_ITERS, ALPHA = 10, 2.0

    key = jax.random.PRNGKey(0)
    k_tok, k_w, k_len, k_init = jax.random.split(key, 4)

    tok = jax.random.normal(k_tok, (N, L, D), jnp.float32)
    # give the toy data a 2-cluster structure so the clustering is non-trivial
    group = jnp.where(jnp.arange(N)[:, None, None] < N // 2, 2.0, -2.0)
    tok = tok + group

    lengths = jax.random.randint(k_len, (N,), 3, L + 1)
    mask = (jnp.arange(L)[None, :] < lengths[:, None]).astype(jnp.float32)

    w_emb = (jax.random.normal(k_w, (D, H), jnp.float32) / np.sqrt(D)).astype(jnp.float32)

    # random.sample(range(N), K) stand-in: deterministic seeded permutation
    init_idx = jax.random.permutation(k_init, N)[:K]

    C, a = qs_clustering_forward(tok, mask, w_emb, init_idx,
                                 num_iters=NUM_ITERS, alpha=ALPHA)
    C = jax.block_until_ready(C)
    a = jax.block_until_ready(a)

    C_ref, a_ref = _reference(tok, mask, w_emb, init_idx, NUM_ITERS, ALPHA)

    # tolerance absorbs the approximate EUP reciprocals and the bf16 MXU
    # operands in the DKM iterations
    np.testing.assert_allclose(np.asarray(C), np.asarray(C_ref), rtol=5e-3, atol=5e-3)
    np.testing.assert_allclose(np.asarray(a), np.asarray(a_ref), rtol=5e-3, atol=5e-3)

    print("KERNEL_OK")
</pallas_src>

<mosaic_0001>
module attributes {stable_mosaic.version = 11 : i64} {
  func.func @_encoder_kernel(%arg0: i32, %arg1: memref<16x8x32xf32, #tpu.memory_space<vmem>>, %arg2: memref<16x8x1xf32, #tpu.memory_space<vmem>>, %arg3: memref<32x128xf32, #tpu.memory_space<vmem>>, %arg4: memref<16x128xf32, #tpu.memory_space<vmem>>) attributes {dimension_semantics = [#tpu.dimension_semantics<parallel>], iteration_bounds = array<i64: 1>, scalar_prefetch = 0 : i64, scratch_operands = 0 : i64, tpu.core_type = #tpu.core_type<tc>, window_params = [{transform_indices = @transform_0, window_bounds = array<i64: 16, 8, 32>}, {transform_indices = @transform_1, window_bounds = array<i64: 16, 8, 1>}, {pipeline_mode = #tpu.pipeline_mode<synchronous>, transform_indices = @transform_2, window_bounds = array<i64: 32, 128>}, {transform_indices = @transform_3, window_bounds = array<i64: 16, 128>}]} {
    %c0 = arith.constant 0 : index
    %c0_0 = arith.constant 0 : index
    %c0_1 = arith.constant 0 : index
    %0 = vector.load %arg1[%c0, %c0_0, %c0_1] : memref<16x8x32xf32, #tpu.memory_space<vmem>>, vector<16x8x32xf32>
    %c0_2 = arith.constant 0 : index
    %c0_3 = arith.constant 0 : index
    %c0_4 = arith.constant 0 : index
    %1 = vector.load %arg2[%c0_2, %c0_3, %c0_4] : memref<16x8x1xf32, #tpu.memory_space<vmem>>, vector<16x8x1xf32>
    %2 = vector.broadcast %1 : vector<16x8x1xf32> to vector<16x8x32xf32>
    %3 = arith.mulf %0, %2 : vector<16x8x32xf32>
    %cst = arith.constant dense<0.000000e+00> : vector<16x32xf32>
    %4 = vector.multi_reduction <add>, %3, %cst [1] : vector<16x8x32xf32> to vector<16x32xf32>
    %cst_5 = arith.constant dense<0.000000e+00> : vector<16x1xf32>
    %5 = vector.multi_reduction <add>, %1, %cst_5 [1] : vector<16x8x1xf32> to vector<16x1xf32>
    %cst_6 = arith.constant 9.99999971E-10 : f32
    %6 = vector.broadcast %cst_6 : f32 to vector<16x1xf32>
    %7 = arith.maximumf %5, %6 : vector<16x1xf32>
    %8 = tpu.reciprocal %7 {approx = true} : vector<16x1xf32> -> vector<16x1xf32>
    %9 = vector.broadcast %8 : vector<16x1xf32> to vector<16x32xf32>
    %10 = arith.mulf %4, %9 : vector<16x32xf32>
    %c0_7 = arith.constant 0 : index
    %c0_8 = arith.constant 0 : index
    %11 = vector.load %arg3[%c0_7, %c0_8] : memref<32x128xf32, #tpu.memory_space<vmem>>, vector<32x128xf32>
    %cst_9 = arith.constant dense<0.000000e+00> : vector<16x128xf32>
    %12 = tpu.matmul %10, %11, %cst_9 {dimension_numbers = #tpu.dot_dimension_numbers<[1], [0], [0], [1], [0, 0, 1, 1], [], []>} : vector<16x32xf32>, vector<32x128xf32>, vector<16x128xf32> -> vector<16x128xf32>
    %c0_10 = arith.constant 0 : index
    %c0_11 = arith.constant 0 : index
    %13 = vector.load %arg4[%c0_10, %c0_11] : memref<16x128xf32, #tpu.memory_space<vmem>>, vector<16x128xf32>
    tpu.vector_store %arg4[%c0_10, %c0_11], %12 {strides = array<i32>} : memref<16x128xf32, #tpu.memory_space<vmem>>, vector<16x128xf32>,
    return
  }
  func.func @transform_0(%arg0: i32) -> (i32, i32, i32) {
    %c0_i32 = arith.constant 0 : i32
    %c0_i32_0 = arith.constant 0 : i32
    %c0_i32_1 = arith.constant 0 : i32
    return %arg0, %c0_i32, %c0_i32_0 : i32, i32, i32
  }
  func.func @transform_1(%arg0: i32) -> (i32, i32, i32) {
    %c0_i32 = arith.constant 0 : i32
    %c0_i32_0 = arith.constant 0 : i32
    %c0_i32_1 = arith.constant 0 : i32
    return %arg0, %c0_i32, %c0_i32_0 : i32, i32, i32
  }
  func.func @transform_2(%arg0: i32) -> (i32, i32) {
    %c0_i32 = arith.constant 0 : i32
    %c0_i32_0 = arith.constant 0 : i32
    %c0_i32_1 = arith.constant 0 : i32
    return %c0_i32, %c0_i32_0 : i32, i32
  }
  func.func @transform_3(%arg0: i32) -> (i32, i32) {
    %c0_i32 = arith.constant 0 : i32
    %c0_i32_0 = arith.constant 0 : i32
    return %arg0, %c0_i32 : i32, i32
  }
}

</mosaic_0001>

<bundles_post_ra>
// kernel: tpu_custom_call.1
= control target key start
LH: loop header
LB: loop body
LE: loop exit
PB: predicated region body
PF: predicated region fallthrough
CT: control target
= control target key end

     0   :  { %8 = vsyncpa [#allocation3], 0  ;;  %s984_s0 = inlined_call_operand.vmem [shape: f32[16,8,32], index: 0, kind: input, shape index: {}]   ;;  %s985_s1 = inlined_call_operand.vmem [shape: f32[16,8,1], index: 1, kind: input, shape index: {}]   ;;  %s986_s2 = inlined_call_operand.hbm [shape: f32[32,128], index: 2, kind: input, shape index: {}]   ;;  %s987_s3 = inlined_call_operand.hbm [shape: f32[16,128], index: 3, kind: output, shape index: {}]  }
   0x1   :  { %9 = vsyncpa [#allocation4], 0  ;;  %s764_s12 = smov [#allocation2]   ;;  %s716_s16 = scalar_lea.hbm %s986_s2, 512 }
   0x2   :  { %s19_s13 = sshll.u32 %s764_s12, 4  ;;  %p717_p0 = scmp.ne.s32.totalorder %s986_s2, %s716_s16  ;;  %s20_s13 = int_to_ptr.vmem [resolvable:$true] %s19_s13 }
   0x3   :  { %p720_p1 = scmp.lt.u32.totalorder %s716_s16, %s986_s2 }
   0x5   :  { %p722_p2 = pnand %p720_p1, %p717_p0 }
   0x7   :  { %725 = shalt.err (!%p722_p2)
}
   0x8   :  { %s726_s21 = scalar_lea.vmem %s20_s13, 512  ;;  %p731_p4 = scmp.lt.s32.totalorder %s20_s13, %s20_s13 }
   0x9   :  { %p727_p3 = scmp.ne.s32.totalorder %s20_s13, %s726_s21  ;;  %p732_p5 = scmp.lt.s32.totalorder %s726_s21, %s726_s21 }
   0xb   :  { %p733_p6 = por %p732_p5, %p731_p4 }
   0xd   :  { %p734_p7 = pnand %p733_p6, %p727_p3 }
   0xf   :  { %737 = shalt.err (!%p734_p7)
}
  0x10   :  { %s765_s22 = smov 128   ;;  %s766_s23 = smov 8  }
  0x11   :  { %25 = dma.hbm_to_vmem [thread:$0]  %s986_s2, 512, %s20_s13, [#allocation3], %s765_s22, %s765_s22, %s766_s23  }
  0x12   :  { %760 = dma.done.wait [#allocation3], 512  }
  0x13   :  { %761 = vsyncadd [#allocation3], 4294966784  ;;  %v767_v0 = vmov 0   ;;  %vm270_vm0 = vcmask 7168   ;;  %v47_v1 = vld [vmem:[%s985_s1 + $0x10] sm:$0xff]  ;;  %v45_v2 = vld [vmem:[%s985_s1] sm:$0xff] }
  0x14   :  { %683 = vset.pattern.permute.xlu1 %v767_v0  ;;  %682 = vset.pattern.permute.xlu0 %v767_v0  ;;  %v53_v3 = vld [vmem:[%s985_s1 + $0x40] sm:$0xff]  ;;  %v285_v4 = vsel %vm270_vm0, %v47_v1, 0.0  ;;  %v271_v5 = vsel %vm270_vm0, %v45_v2, 0.0  ;;  %v46_v7 = vld [vmem:[%s985_s1 + $0x8] sm:$0xff]  ;;  %v48_v8 = vld [vmem:[%s985_s1 + $0x18] sm:$0xff]  ;;  %vm157_vm1 = vcmask 261120  }
  0x15   :  { %73 = vperm.xlu1 %683, %v47_v1   ;;  %63 = vperm.xlu0 %682, %v45_v2   ;;  %v327_v6 = vsel %vm270_vm0, %v53_v3, 0.0  ;;  %v286_v9 = vrot.slane %v285_v4, 4  ;;  %v272_v10 = vrot.slane %v271_v5, 4  ;;  %v278_v12 = vsel %vm270_vm0, %v46_v7, 0.0  ;;  %v54_v13 = vld [vmem:[%s985_s1 + $0x48] sm:$0xff]  ;;  %v49_v14 = vld [vmem:[%s985_s1 + $0x20] sm:$0xff] }
  0x16   :  { %v328_v11 = vrot.slane %v327_v6, 4  ;;  %v279_v15 = vrot.slane %v278_v12, 4  ;;  %v292_v16 = vsel %vm270_vm0, %v48_v8, 0.0  ;;  %v334_v17 = vsel %vm270_vm0, %v54_v13, 0.0  ;;  %v55_v23 = vld [vmem:[%s985_s1 + $0x50] sm:$0xff]  ;;  %v50_v63 = vld [vmem:[%s985_s1 + $0x28] sm:$0xff] }
  0x17   :  { %v299_v18 = vsel %vm270_vm0, %v49_v14, 0.0  ;;  %v287_v19 = vadd.f32 %v286_v9, %v285_v4  ;;  %v273_v20 = vadd.f32 %v272_v10, %v271_v5  ;;  %v293_v22 = vrot.slane %v292_v16, 4  ;;  %v56_v0 = vld [vmem:[%s985_s1 + $0x58] sm:$0xff]  ;;  %v51_v10 = vld [vmem:[%s985_s1 + $0x30] sm:$0xff] }
  0x18   :  { %v329_v21 = vadd.f32 %v328_v11, %v327_v6  ;;  %v280_v24 = vadd.f32 %v279_v15, %v278_v12  ;;  %v335_v25 = vrot.slane %v334_v17, 4  ;;  %v300_v26 = vrot.slane %v299_v18, 4  ;;  %v57_v15 = vld [vmem:[%s985_s1 + $0x60] sm:$0xff] }
  0x19   :  { %103 = vperm.xlu1 %683, %v53_v3   ;;  %68 = vperm.xlu0 %682, %v46_v7   ;;  %v341_v27 = vsel %vm270_vm0, %v55_v23, 0.0  ;;  %v288_v28 = vrot.slane %v287_v19, 2  ;;  %v274_v29 = vrot.slane %v273_v20, 2  ;;  %v294_v31 = vadd.f32 %v293_v22, %v292_v16  ;;  %v52_v22 = vld [vmem:[%s985_s1 + $0x38] sm:$0xff] }
  0x1a   :  { %v330_v30 = vrot.slane %v329_v21, 2  ;;  %v281_v32 = vrot.slane %v280_v24, 2  ;;  %v336_v33 = vadd.f32 %v335_v25, %v334_v17  ;;  %v301_v34 = vadd.f32 %v300_v26, %v299_v18 }
  0x1b   :  { %v342_v35 = vrot.slane %v341_v27, 4  ;;  %v289_v36 = vadd.f32 %v288_v28, %v287_v19  ;;  %v275_v37 = vadd.f32 %v274_v29, %v273_v20  ;;  %v295_v39 = vrot.slane %v294_v31, 2 }
  0x1c   :  { %v331_v38 = vadd.f32 %v330_v30, %v329_v21  ;;  %v282_v40 = vadd.f32 %v281_v32, %v280_v24  ;;  %v337_v41 = vrot.slane %v336_v33, 2  ;;  %v302_v42 = vrot.slane %v301_v34, 2 }
  0x1d   :  { %78 = vperm.xlu1 %683, %v48_v8   ;;  %108 = vperm.xlu0 %682, %v54_v13   ;;  %v343_v43 = vadd.f32 %v342_v35, %v341_v27  ;;  %v290_v44 = vrot.slane %v289_v36, 1  ;;  %v276_v45 = vrot.slane %v275_v37, 1  ;;  %v296_v47 = vadd.f32 %v295_v39, %v294_v31 }
  0x1e   :  { %v332_v46 = vrot.slane %v331_v38, 1  ;;  %v283_v48 = vrot.slane %v282_v40, 1  ;;  %v338_v49 = vadd.f32 %v337_v41, %v336_v33  ;;  %v303_v50 = vadd.f32 %v302_v42, %v301_v34  ;;  %v60_v34 = vld [vmem:[%s985_s1 + $0x78] sm:$0xff] }
  0x1f   :  { %v344_v51 = vrot.slane %v343_v43, 2  ;;  %v291_v52 = vadd.f32 %v290_v44, %v289_v36  ;;  %v277_v53 = vadd.f32 %v276_v45, %v275_v37  ;;  %v297_v55 = vrot.slane %v296_v47, 1 }
  0x20   :  { %v333_v54 = vadd.f32 %v332_v46, %v331_v38  ;;  %v284_v56 = vadd.f32 %v283_v48, %v282_v40  ;;  %v339_v57 = vrot.slane %v338_v49, 1  ;;  %v304_v58 = vrot.slane %v303_v50, 1 }
  0x21   :  { %83 = vperm.xlu1 %683, %v49_v14   ;;  %v345_v59 = vadd.f32 %v344_v51, %v343_v43  ;;  %113 = vperm.xlu0 %682, %v55_v23   ;;  %v385_v60 = vmax.f32 %v291_v52, 1e-09  ;;  %v383_v61 = vmax.f32 %v277_v53, 1e-09  ;;  %v298_v62 = vadd.f32 %v297_v55, %v296_v47  ;;  %v58_v23 = vld [vmem:[%s985_s1 + $0x68] sm:$0xff]  ;;  %v59_v43 = vld [vmem:[%s985_s1 + $0x70] sm:$0xff] }
  0x22   :  { %v391_v1 = vmax.f32 %v333_v54, 1e-09  ;;  %v340_v2 = vadd.f32 %v339_v57, %v338_v49  ;;  %v842_v3 = vadd.f32 %v304_v58, %v303_v50  ;;  %v384_v5 = vmax.f32 %v284_v56, 1e-09 }
  0x23   :  { %v346_v4 = vrot.slane %v345_v59, 1  ;;  %684 = vrcp.f32 %v385_v60  ;;  %v306_v6 = vsel %vm270_vm0, %v50_v63, 0.0  ;;  %v348_v7 = vsel %vm270_vm0, %v56_v0, 0.0 }
  0x24   :  { %686 = vrcp.f32 %v383_v61  ;;  %v386_v8 = vmax.f32 %v298_v62, 1e-09  ;;  %v392_v11 = vmax.f32 %v340_v2, 1e-09  ;;  %v307_v12 = vrot.slane %v306_v6, 4 }
  0x25   :  { %v846_v9 = vadd.f32 %v346_v4, %v345_v59  ;;  %88 = vperm.xlu1 %683, %v50_v63   ;;  %118 = vperm.xlu0 %682, %v56_v0   ;;  %v349_v13 = vrot.slane %v348_v7, 4  ;;  %v313_v14 = vsel %vm270_vm0, %v51_v10, 0.0  ;;  %688 = vrcp.f32 %v391_v1 }
  0x26   :  { %v387_v16 = vmax.f32 %v842_v3, 1e-09  ;;  %v314_v17 = vrot.slane %v313_v14, 4  ;;  %v355_v18 = vsel %vm270_vm0, %v57_v15, 0.0  ;;  %690 = vrcp.f32 %v384_v5 }
  0x27   :  { %v308_v19 = vadd.f32 %v307_v12, %v306_v6  ;;  %v350_v20 = vadd.f32 %v349_v13, %v348_v7  ;;  %v356_v21 = vrot.slane %v355_v18, 4  ;;  %v393_v24 = vmax.f32 %v846_v9, 1e-09 }
  0x28   :  { %v315_v25 = vadd.f32 %v314_v17, %v313_v14  ;;  %v320_v26 = vsel %vm270_vm0, %v52_v22, 0.0  ;;  %v362_v27 = vsel %vm270_vm0, %v58_v23, 0.0  ;;  %692 = vrcp.f32 %v386_v8 }
  0x29   :  { %93 = vperm.xlu1 %683, %v51_v10   ;;  %123 = vperm.xlu0 %682, %v57_v15   ;;  %v309_v28 = vrot.slane %v308_v19, 2  ;;  %v351_v29 = vrot.slane %v350_v20, 2  ;;  %v357_v30 = vadd.f32 %v356_v21, %v355_v18  ;;  %694 = vrcp.f32 %v392_v11 }
  0x2a   :  { %v316_v31 = vrot.slane %v315_v25, 2  ;;  %v321_v32 = vrot.slane %v320_v26, 4  ;;  %v363_v33 = vrot.slane %v362_v27, 4  ;;  %v376_v38 = vsel %vm270_vm0, %v60_v34, 0.0 }
  0x2b   :  { %v310_v35 = vadd.f32 %v309_v28, %v308_v19  ;;  %v352_v36 = vadd.f32 %v351_v29, %v350_v20  ;;  %v358_v37 = vrot.slane %v357_v30, 2  ;;  %v377_v42 = vrot.slane %v376_v38, 4 }
  0x2c   :  { %v317_v39 = vadd.f32 %v316_v31, %v315_v25  ;;  %v322_v40 = vadd.f32 %v321_v32, %v320_v26  ;;  %v364_v41 = vadd.f32 %v363_v33, %v362_v27  ;;  %v369_v48 = vsel %vm270_vm0, %v59_v43, 0.0  ;;  %v511_v31 = vld [vmem:[#allocation2] sm:$0xff]  ;;  %v512_v32 = vld [vmem:[#allocation2 + $0x8] sm:$0xff] }
  0x2d   :  { %98 = vperm.xlu1 %683, %v52_v22   ;;  %128 = vperm.xlu0 %682, %v58_v23   ;;  %v685_v44 = vpop.eup %684  ;;  %v311_v45 = vrot.slane %v310_v35, 1  ;;  %v353_v46 = vrot.slane %v352_v36, 1  ;;  %v359_v47 = vadd.f32 %v358_v37, %v357_v30  ;;  %v378_v53 = vadd.f32 %v377_v42, %v376_v38  ;;  %v514_v37 = vld [vmem:[#allocation2 + $0x18] sm:$0xff] }
  0x2e   :  { %v687_v49 = vpop.eup %686  ;;  %v318_v50 = vrot.slane %v317_v39, 1  ;;  %v323_v51 = vrot.slane %v322_v40, 2  ;;  %v365_v52 = vrot.slane %v364_v41, 2  ;;  %v370_v57 = vrot.slane %v369_v48, 4 }
  0x2f   :  { %v312_v54 = vadd.f32 %v311_v45, %v310_v35  ;;  %v354_v55 = vadd.f32 %v353_v46, %v352_v36  ;;  %v360_v56 = vrot.slane %v359_v47, 1  ;;  %v689_v58 = vpop.eup %688  ;;  %696 = vrcp.f32 %v387_v16  ;;  %v513_v36 = vld [vmem:[#allocation2 + $0x10] sm:$0xff] }
  0x30   :  { %v324_v59 = vadd.f32 %v323_v51, %v322_v40  ;;  %v366_v60 = vadd.f32 %v365_v52, %v364_v41  ;;  %v379_v61 = vrot.slane %v378_v53, 2  ;;  %v691_v62 = vpop.eup %690  ;;  %698 = vrcp.f32 %v393_v24 }
  0x31   :  { %138 = vperm.xlu1 %683, %v60_v34   ;;  %133 = vperm.xlu0 %682, %v59_v43   ;;  %v371_v63 = vadd.f32 %v370_v57, %v369_v48  ;;  %v388_v0 = vmax.f32 %v312_v54, 1e-09  ;;  %v319_v1 = vadd.f32 %v318_v50, %v317_v39  ;;  %v394_v5 = vmax.f32 %v354_v55, 1e-09  ;;  %v29_v48 = vld [vmem:[%s984_s0] sm:$0xff]  ;;  %v30_v50 = vld [vmem:[%s984_s0 + $0x8] sm:$0xff] }
  0x32   :  { %v325_v2 = vrot.slane %v324_v59, 1  ;;  %v380_v3 = vadd.f32 %v379_v61, %v378_v53  ;;  %v693_v4 = vpop.eup %692  ;;  %v361_v6 = vadd.f32 %v360_v56, %v359_v47  ;;  %v367_v7 = vrot.slane %v366_v60, 1  ;;  %v31_v47 = vld [vmem:[%s984_s0 + $0x10] sm:$0xff]  ;;  %v32_v55 = vld [vmem:[%s984_s0 + $0x18] sm:$0xff]  ;;  %v33_v61 = vld [vmem:[%s984_s0 + $0x20] sm:$0xff] }
  0x33   :  { %v372_v8 = vrot.slane %v371_v63, 2  ;;  %v695_v9 = vpop.eup %694  ;;  %700 = vrcp.f32 %v388_v0  ;;  %v389_v11 = vmax.f32 %v319_v1, 1e-09  ;;  %v669_v33 = vpack.c.bf16 %v512_v32, %v511_v31  ;;  %v39_v1 = vld [vmem:[%s984_s0 + $0x50] sm:$0xff] }
  0x34   :  { %v326_v12 = vadd.f32 %v325_v2, %v324_v59  ;;  %v381_v13 = vrot.slane %v380_v3, 1  ;;  %702 = vrcp.f32 %v394_v5  ;;  %v395_v14 = vmax.f32 %v361_v6, 1e-09  ;;  %v34_v2 = vld [vmem:[%s984_s0 + $0x28] sm:$0xff]  ;;  %v35_v5 = vld [vmem:[%s984_s0 + $0x30] sm:$0xff] }
  0x35   :  { %422 = vperm.xlu1 %683, %v691_v62   ;;  %417 = vperm.xlu0 %682, %v687_v49   ;;  %v373_v10 = vadd.f32 %v372_v8, %v371_v63  ;;  %v368_v15 = vadd.f32 %v367_v7, %v366_v60  ;;  %704 = vrcp.f32 %v389_v11  ;;  %v673_v38 = vpack.c.bf16 %v514_v37, %v513_v36  ;;  %v37_v49 = vld [vmem:[%s984_s0 + $0x40] sm:$0xff]  ;;  %v38_v60 = vld [vmem:[%s984_s0 + $0x48] sm:$0xff] }
  0x36   :  { %v390_v18 = vmax.f32 %v326_v12, 1e-09  ;;  %v382_v19 = vadd.f32 %v381_v13, %v380_v3  ;;  %706 = vrcp.f32 %v395_v14  ;;  %670 = vmatprep.subr.bf16.mxu0 %v669_v33  ;;  %vm531_vm2 = vcmask 1041409  }
  0x37   :  { %v374_v16 = vrot.slane %v373_v10, 1  ;;  %v396_v21 = vmax.f32 %v368_v15, 1e-09  ;;  %672 = vmatpush3.bf16.msra.mxu0 %v669_v33  ;;  %vm533_vm3 = vcmask 1042434   ;;  %vm535_vm4 = vcmask 1043459  }
  0x38   :  { %708 = vrcp.f32 %v390_v18  ;;  %v398_v23 = vmax.f32 %v382_v19, 1e-09  ;;  %674 = vmatprep.subr.bf16.mxu0 %v673_v38  ;;  %vm537_vm5 = vcmask 1044484   ;;  %vm539_vm6 = vcmask 1045509  }
  0x39   :  { %457 = vperm.xlu1 %683, %v689_v58   ;;  %427 = vperm.xlu0 %682, %v685_v44   ;;  %v697_v17 = vpop.eup %696  ;;  %v375_v22 = vadd.f32 %v374_v16, %v373_v10  ;;  %710 = vrcp.f32 %v396_v21  ;;  %v41_v10 = vld [vmem:[%s984_s0 + $0x60] sm:$0xff]  ;;  %v36_v16 = vld [vmem:[%s984_s0 + $0x38] sm:$0xff]  ;;  %vm541_vm7 = vcmask 1046534   ;;  %vm543_vm8 = vcmask 1047559  }
  0x3a   :  { %v699_v20 = vpop.eup %698  ;;  %712 = vrcp.f32 %v398_v23  ;;  %v42_v23 = vld [vmem:[%s984_s0 + $0x68] sm:$0xff] }
  0x3b   :  { %v397_v24 = vmax.f32 %v375_v22, 1e-09  ;;  %676 = vmatpush3.bf16.msra.mxu0 %v673_v38  ;;  %v44_v38 = vld [vmem:[%s984_s0 + $0x78] sm:$0xff] }
  0x3d   :  { %432 = vperm.xlu1 %683, %v693_v4   ;;  %462 = vperm.xlu0 %682, %v695_v9   ;;  %v701_v25 = vpop.eup %700  ;;  %714 = vrcp.f32 %v397_v24  ;;  %v40_v9 = vld [vmem:[%s984_s0 + $0x58] sm:$0xff] }
  0x3e   :  { %v703_v26 = vpop.eup %702 }
  0x3f   :  { %v705_v27 = vpop.eup %704 }
  0x40   :  { %v707_v28 = vpop.eup %706 }
  0x41   :  { %437 = vperm.xlu1 %683, %v697_v17   ;;  %467 = vperm.xlu0 %682, %v699_v20  }
  0x42   :  { %v709_v29 = vpop.eup %708 }
  0x43   :  { %v711_v30 = vpop.eup %710 }
  0x44   :  { %v713_v34 = vpop.eup %712 }
  0x45   :  { %442 = vperm.xlu1 %683, %v701_v25   ;;  %472 = vperm.xlu0 %682, %v703_v26  }
  0x47   :  { %v715_v35 = vpop.eup %714 }
  0x49   :  { %447 = vperm.xlu1 %683, %v705_v27   ;;  %477 = vperm.xlu0 %682, %v707_v28  }
  0x4d   :  { %452 = vperm.xlu1 %683, %v709_v29   ;;  %482 = vperm.xlu0 %682, %v711_v30  }
  0x51   :  { %492 = vperm.xlu1 %683, %v713_v34   ;;  %487 = vperm.xlu0 %682, %v715_v35  }
  0x94   :  { %v74_v39 = vpop.permute.xlu1 %73  ;;  %v64_v40 = vpop.permute.xlu0 %63 }
  0x95   :  { %v143_v51 = vmul.f32 %v74_v39, %v31_v47  ;;  %v141_v54 = vmul.f32 %v64_v40, %v29_v48  ;;  %v43_v39 = vld [vmem:[%s984_s0 + $0x70] sm:$0xff]  ;;  %s768_s0 = smov [#allocation5]  }
  0x96   :  { %s638_s8 = sshll.u32 %s768_s0, 4  ;;  %s639_s8 = int_to_ptr.vmem [resolvable:$true] %s638_s8 }
  0x97   :  { %v172_v58 = vsel %vm157_vm1, %v143_v51, 0.0  ;;  %v158_v0 = vsel %vm157_vm1, %v141_v54, 0.0  ;;  %s738_s9 = scalar_lea.vmem %s639_s8, 256  ;;  %p743_p9 = scmp.lt.s32.totalorder %s639_s8, %s639_s8 }
  0x98   :  { %v104_v41 = vpop.permute.xlu1 %103  ;;  %v69_v42 = vpop.permute.xlu0 %68  ;;  %v173_v6 = vrot.slane %v172_v58, 4  ;;  %v159_v11 = vrot.slane %v158_v0, 4  ;;  %p739_p8 = scmp.ne.s32.totalorder %s639_s8, %s738_s9  ;;  %p744_p10 = scmp.lt.s32.totalorder %s738_s9, %s738_s9 }
  0x99   :  { %v149_v56 = vmul.f32 %v104_v41, %v37_v49  ;;  %v142_v57 = vmul.f32 %v69_v42, %v30_v50 }
  0x9a   :  { %v174_v28 = vadd.f32 %v173_v6, %v172_v58  ;;  %v160_v29 = vadd.f32 %v159_v11, %v158_v0  ;;  %p745_p11 = por %p744_p10, %p743_p9 }
  0x9b   :  { %v214_v3 = vsel %vm157_vm1, %v149_v56, 0.0  ;;  %v165_v4 = vsel %vm157_vm1, %v142_v57, 0.0 }
  0x9c   :  { %v79_v43 = vpop.permute.xlu1 %78  ;;  %v109_v44 = vpop.permute.xlu0 %108  ;;  %v215_v18 = vrot.slane %v214_v3, 4  ;;  %v166_v19 = vrot.slane %v165_v4, 4  ;;  %v175_v48 = vrot.slane %v174_v28, 2  ;;  %v161_v54 = vrot.slane %v160_v29, 2  ;;  %p746_p12 = pnand %p745_p11, %p739_p8 }
  0x9d   :  { %v144_v59 = vmul.f32 %v79_v43, %v32_v55  ;;  %v150_v7 = vmul.f32 %v109_v44, %v38_v60 }
  0x9e   :  { %v216_v34 = vadd.f32 %v215_v18, %v214_v3  ;;  %v167_v35 = vadd.f32 %v166_v19, %v165_v4  ;;  %v176_v11 = vadd.f32 %v175_v48, %v174_v28 }
  0x9f   :  { %v179_v12 = vsel %vm157_vm1, %v144_v59, 0.0  ;;  %v221_v25 = vsel %vm157_vm1, %v150_v7, 0.0 }
  0xa0   :  { %v84_v45 = vpop.permute.xlu1 %83  ;;  %v114_v46 = vpop.permute.xlu0 %113  ;;  %v180_v24 = vrot.slane %v179_v12, 4  ;;  %v222_v40 = vrot.slane %v221_v25, 4  ;;  %v168_v58 = vrot.slane %v167_v35, 2 }
  0xa1   :  { %v145_v8 = vmul.f32 %v84_v45, %v33_v61  ;;  %v151_v13 = vmul.f32 %v114_v46, %v39_v1 }
  0xa2   :  { %v181_v44 = vadd.f32 %v180_v24, %v179_v12  ;;  %v223_v59 = vadd.f32 %v222_v40, %v221_v25 }
  0xa3   :  { %v186_v26 = vsel %vm157_vm1, %v145_v8, 0.0  ;;  %v228_v30 = vsel %vm157_vm1, %v151_v13, 0.0 }
  0xa4   :  { %v89_v52 = vpop.permute.xlu1 %88  ;;  %v119_v53 = vpop.permute.xlu0 %118  ;;  %v187_v41 = vrot.slane %v186_v26, 4  ;;  %v229_v45 = vrot.slane %v228_v30, 4  ;;  %v224_v12 = vrot.slane %v223_v59, 2 }
  0xa5   :  { %v146_v14 = vmul.f32 %v89_v52, %v34_v2  ;;  %v152_v21 = vmul.f32 %v119_v53, %v40_v9 }
  0xa6   :  { %v188_v60 = vadd.f32 %v187_v41, %v186_v26  ;;  %v230_v0 = vadd.f32 %v229_v45, %v228_v30 }
  0xa7   :  { %v193_v31 = vsel %vm157_vm1, %v146_v14, 0.0  ;;  %v235_v42 = vsel %vm157_vm1, %v152_v21, 0.0 }
  0xa8   :  { %v94_v62 = vpop.permute.xlu1 %93  ;;  %v124_v63 = vpop.permute.xlu0 %123  ;;  %v194_v46 = vrot.slane %v193_v31, 4  ;;  %v236_v55 = vrot.slane %v235_v42, 4  ;;  %v189_v13 = vrot.slane %v188_v60, 2 }
  0xa9   :  { %v147_v20 = vmul.f32 %v94_v62, %v35_v5  ;;  %v153_v22 = vmul.f32 %v124_v63, %v41_v10  ;;  %v217_v62 = vrot.slane %v216_v34, 2  ;;  %v182_v63 = vrot.slane %v181_v44, 2 }
  0xaa   :  { %v195_v1 = vadd.f32 %v194_v46, %v193_v31  ;;  %v237_v8 = vadd.f32 %v236_v55, %v235_v42  ;;  %v162_v10 = vadd.f32 %v161_v54, %v160_v29  ;;  %v177_v29 = vrot.slane %v176_v11, 1 }
  0xab   :  { %v200_v36 = vsel %vm157_vm1, %v147_v20, 0.0  ;;  %v242_v43 = vsel %vm157_vm1, %v153_v22, 0.0  ;;  %v218_v19 = vadd.f32 %v217_v62, %v216_v34  ;;  %v231_v20 = vrot.slane %v230_v0, 2 }
  0xac   :  { %v99_v15 = vpop.permute.xlu1 %98  ;;  %v129_v17 = vpop.permute.xlu0 %128  ;;  %v201_v49 = vrot.slane %v200_v36, 4  ;;  %v243_v56 = vrot.slane %v242_v43, 4  ;;  %v183_v24 = vadd.f32 %v182_v63, %v181_v44  ;;  %v238_v26 = vrot.slane %v237_v8, 2 }
  0xad   :  { %v148_v27 = vmul.f32 %v99_v15, %v36_v16  ;;  %v154_v37 = vmul.f32 %v129_v17, %v42_v23  ;;  %v169_v15 = vadd.f32 %v168_v58, %v167_v35  ;;  %v196_v16 = vrot.slane %v195_v1, 2 }
  0xae   :  { %v202_v2 = vadd.f32 %v201_v49, %v200_v36  ;;  %v244_v9 = vadd.f32 %v243_v56, %v242_v43  ;;  %v163_v30 = vrot.slane %v162_v10, 1  ;;  %v232_v42 = vadd.f32 %v231_v20, %v230_v0 }
  0xaf   :  { %v207_v47 = vsel %vm157_vm1, %v148_v27, 0.0  ;;  %v249_v57 = vsel %vm157_vm1, %v154_v37, 0.0  ;;  %v170_v31 = vrot.slane %v169_v15, 1  ;;  %v219_v37 = vrot.slane %v218_v19, 1 }
  0xb0   :  { %v139_v32 = vpop.permute.xlu1 %138  ;;  %v134_v33 = vpop.permute.xlu0 %133  ;;  %v208_v61 = vrot.slane %v207_v47, 4  ;;  %v250_v3 = vrot.slane %v249_v57, 4  ;;  %v203_v21 = vrot.slane %v202_v2, 2  ;;  %v245_v27 = vrot.slane %v244_v9, 2 }
  0xb1   :  { %v156_v50 = vmul.f32 %v139_v32, %v44_v38  ;;  %v155_v51 = vmul.f32 %v134_v33, %v43_v39  ;;  %v225_v32 = vadd.f32 %v224_v12, %v223_v59  ;;  %v190_v33 = vadd.f32 %v189_v13, %v188_v60 }
  0xb2   :  { %v209_v14 = vadd.f32 %v208_v61, %v207_v47  ;;  %v251_v22 = vadd.f32 %v250_v3, %v249_v57  ;;  %v197_v34 = vadd.f32 %v196_v16, %v195_v1  ;;  %v184_v39 = vrot.slane %v183_v24, 1 }
  0xb3   :  { %v263_v4 = vsel %vm157_vm1, %v156_v50, 0.0  ;;  %v256_v5 = vsel %vm157_vm1, %v155_v51, 0.0  ;;  %v204_v43 = vadd.f32 %v203_v21, %v202_v2  ;;  %v164_v44 = vadd.f32 %v163_v30, %v162_v10 }
  0xb4   :  { %v935_v52 = vpop.permute.xlu1 %422  ;;  %v937_v53 = vpop.permute.xlu0 %417  ;;  %v264_v17 = vrot.slane %v263_v4, 4  ;;  %v257_v18 = vrot.slane %v256_v5, 4  ;;  %v210_v28 = vrot.slane %v209_v14, 2  ;;  %v252_v38 = vrot.slane %v251_v22, 2 }
  0xb5   :  { %v178_v45 = vadd.f32 %v177_v29, %v176_v11  ;;  %v239_v46 = vadd.f32 %v238_v26, %v237_v8  ;;  %v246_v47 = vadd.f32 %v245_v27, %v244_v9  ;;  %v171_v48 = vadd.f32 %v170_v31, %v169_v15 }
  0xb6   :  { %v265_v35 = vadd.f32 %v264_v17, %v263_v4  ;;  %v258_v36 = vadd.f32 %v257_v18, %v256_v5  ;;  %v226_v49 = vrot.slane %v225_v32, 1  ;;  %v191_v50 = vrot.slane %v190_v33, 1 }
  0xb7   :  { %v211_v51 = vadd.f32 %v210_v28, %v209_v14  ;;  %v220_v56 = vadd.f32 %v219_v37, %v218_v19  ;;  %v198_v57 = vrot.slane %v197_v34, 1  ;;  %v185_v58 = vadd.f32 %v184_v39, %v183_v24 }
  0xb8   :  { %v942_v6 = vpop.permute.xlu1 %457  ;;  %v944_v7 = vpop.permute.xlu0 %427  ;;  %v266_v54 = vrot.slane %v265_v35, 2  ;;  %v259_v55 = vrot.slane %v258_v36, 2  ;;  %v233_v59 = vrot.slane %v232_v42, 1  ;;  %v205_v62 = vrot.slane %v204_v43, 1 }
  0xb9   :  { %v253_v63 = vadd.f32 %v252_v38, %v251_v22  ;;  %v496_v0 = vmul.f32 %v935_v52, %v171_v48  ;;  %v495_v1 = vmul.f32 %v937_v53, %v164_v44  ;;  %v240_v2 = vrot.slane %v239_v46, 1 }
  0xba   :  { %v247_v3 = vrot.slane %v246_v47, 1  ;;  %v497_v4 = vmul.f32 %v944_v7, %v178_v45  ;;  %v227_v5 = vadd.f32 %v226_v49, %v225_v32  ;;  %v192_v8 = vadd.f32 %v191_v50, %v190_v33 }
  0xbb   :  { %v212_v9 = vrot.slane %v211_v51, 1  ;;  %v199_v11 = vadd.f32 %v198_v57, %v197_v34  ;;  %v267_v12 = vadd.f32 %v266_v54, %v265_v35  ;;  %v260_v13 = vadd.f32 %v259_v55, %v258_v36 }
  0xbc   :  { %v433_v23 = vpop.permute.xlu1 %432  ;;  %v946_v25 = vpop.permute.xlu0 %462  ;;  %v234_v15 = vadd.f32 %v233_v59, %v232_v42  ;;  %v206_v17 = vadd.f32 %v205_v62, %v204_v43  ;;  %v254_v19 = vrot.slane %v253_v63, 1  ;;  %v532_v52 = vsel %vm531_vm2, %v496_v0, %v495_v1 }
  0xbd   :  { %v498_v10 = vmul.f32 %v433_v23, %v185_v58  ;;  %v241_v20 = vadd.f32 %v240_v2, %v239_v46  ;;  %v248_v21 = vadd.f32 %v247_v3, %v246_v47  ;;  %v534_v7 = vsel %vm533_vm3, %v497_v4, %v532_v52 }
  0xbe   :  { %v504_v22 = vmul.f32 %v946_v25, %v227_v5  ;;  %v213_v23 = vadd.f32 %v212_v9, %v211_v51  ;;  %v268_v30 = vrot.slane %v267_v12, 1  ;;  %v261_v29 = vrot.slane %v260_v13, 1 }
  0xbf   :  { %v536_v26 = vsel %vm535_vm4, %v498_v10, %v534_v7  ;;  %v503_v28 = vmul.f32 %v942_v6, %v220_v56  ;;  %v255_v36 = vadd.f32 %v254_v19, %v253_v63 }
  0xc0   :  { %v438_v40 = vpop.permute.xlu1 %437  ;;  %v468_v41 = vpop.permute.xlu0 %467  ;;  %v269_v42 = vadd.f32 %v268_v30, %v267_v12  ;;  %v262_v43 = vadd.f32 %v261_v29, %v260_v13 }
  0xc1   :  { %v499_v14 = vmul.f32 %v438_v40, %v192_v8  ;;  %v505_v27 = vmul.f32 %v468_v41, %v234_v15  ;;  %v545_v25 = vsel %vm531_vm2, %v504_v22, %v503_v28 }
  0xc3   :  { %v538_v31 = vsel %vm537_vm5, %v499_v14, %v536_v26  ;;  %v546_v41 = vsel %vm533_vm3, %v505_v27, %v545_v25 }
  0xc4   :  { %v443_v60 = vpop.permute.xlu1 %442  ;;  %v473_v61 = vpop.permute.xlu0 %472 }
  0xc5   :  { %v500_v53 = vmul.f32 %v443_v60, %v199_v11  ;;  %v506_v32 = vmul.f32 %v473_v61, %v241_v20 }
  0xc7   :  { %v540_v38 = vsel %vm539_vm6, %v500_v53, %v538_v31  ;;  %v547_v44 = vsel %vm535_vm4, %v506_v32, %v546_v41 }
  0xc8   :  { %v448_v16 = vpop.permute.xlu1 %447  ;;  %v478_v18 = vpop.permute.xlu0 %477 }
  0xc9   :  { %v501_v24 = vmul.f32 %v448_v16, %v206_v17  ;;  %v507_v37 = vmul.f32 %v478_v18, %v248_v21 }
  0xcb   :  { %v542_v40 = vsel %vm541_vm7, %v501_v24, %v540_v38  ;;  %v548_v47 = vsel %vm537_vm5, %v507_v37, %v547_v44 }
  0xcc   :  { %v453_v33 = vpop.permute.xlu1 %452  ;;  %v483_v35 = vpop.permute.xlu0 %482 }
  0xcd   :  { %v502_v34 = vmul.f32 %v453_v33, %v213_v23  ;;  %v508_v39 = vmul.f32 %v483_v35, %v255_v36 }
  0xcf   :  { %v544_v6 = vsel %vm543_vm8, %v502_v34, %v542_v40  ;;  %v549_v50 = vsel %vm539_vm6, %v508_v39, %v548_v47 }
  0xd0   :  { %v493_v45 = vpop.permute.xlu1 %492  ;;  %v488_v46 = vpop.permute.xlu0 %487  ;;  %666 = vmatprep.mubr.msk.f32.mxu0 %vm157_vm1, %v544_v6 }
  0xd1   :  { %v510_v48 = vmul.f32 %v493_v45, %v269_v42  ;;  %v509_v49 = vmul.f32 %v488_v46, %v262_v43 }
  0xd3   :  { %v550_v51 = vsel %vm541_vm7, %v509_v49, %v549_v50 }
  0xd4   :  { %v551_v54 = vsel %vm543_vm8, %v510_v48, %v550_v51 }
  0xd5   :  { %667 = vmatmul.mubr.msk.f32.vlgmr.msra.gmra.mrb[0].mxu0 %vm157_vm1, %v551_v54 }
 0x1a8   :  { %v668_v55 = vpop.f32.mrb[0].mxu0 }
 0x1a9   :  { %632 = vst [vmem:[#allocation5 + $0x8] sm:$0xff] %v668_v55  ;;  %v622_v56 = vpop.f32.mrb[1].mxu0 }
 0x1aa   :  { %631 = vst [vmem:[#allocation5] sm:$0xff] %v622_v56 }
 0x1ab   :  { %749 = shalt.err (!%p746_p12)
}
 0x1ac   :  { %s750_s12 = scalar_lea.hbm %s987_s3, 256 }
 0x1ad   :  { %p751_p13 = scmp.ne.s32.totalorder %s987_s3, %s750_s12  ;;  %p754_p0 = scmp.lt.u32.totalorder %s750_s12, %s987_s3 }
 0x1af   :  { %p756_p1 = pnand %p754_p0, %p751_p13 }
 0x1b1   :  { %759 = shalt.err (!%p756_p1)
}
 0x1b2   :  { %644 = dma.vmem_to_hbm [thread:$0]  %s639_s8, 256, %s987_s3, [#allocation4], %s765_s22, %s765_s22, %s766_s23  }
 0x1b3   :  { %762 = dma.done.wait [#allocation4], 256  }
 0x1b4   :  { %763 = vsyncadd [#allocation4], 4294967040 }
 0x1b5   :  { %648 = vsyncpa [#allocation3], 1 }
 0x1b6   :  { %649 = vsyncpa [#allocation4], 1 }

</bundles_post_ra>
